<compile_context>
chip_gen: v7x
topology: tpu7x:2x2x1
jax: 0.10.0
libtpu: 0.0.40
codegen_flags: <defaults>
</compile_context>

<pallas_src>
import jax
import jax.numpy as jnp
from jax.experimental import pallas as pl
from jax.experimental.pallas import tpu as pltpu

HIDDEN_SIZE = 20
INPUT_SIZE = 10
OUTPUT_SIZE = 2


def rnn_kernel(x_ref, rnn_ref, fc_ref, out_ref):
    """Single-invocation kernel (no grid).

    x_ref:   (B, T, D)        raw batch_first input
    rnn_ref: (d_pad + H, H)   packed: rows [0:D]      = W_ih^T
                                      row  [D]        = b_ih + b_hh
                                      rows [D+1:d_pad]= zero padding (alignment)
                                      rows [d_pad:]   = W_hh^T
    fc_ref:  (H + 1, O)       packed: rows [0:H] = W_fc^T, row [H] = b_fc
    out_ref: (B, O)
    """
    B, T, D = x_ref.shape
    H = rnn_ref.shape[1]
    d_pad = rnn_ref.shape[0] - H          # sublane-aligned start of W_hh^T

    # Unpack parameters once (static sublane slices of VMEM-resident buffers).
    w_ih = rnn_ref[:D, :]                 # (D, H)
    b_rnn = rnn_ref[D:D + 1, :]           # (1, H)  fused b_ih + b_hh
    w_hh = rnn_ref[d_pad:, :]             # (H, H)  loop-invariant RHS, hoisted
    w_fc = fc_ref[:H, :]                  # (H, O)
    b_fc = fc_ref[H:H + 1, :]             # (1, O)  folded-in fc bias

    # ---- Input projection for every timestep, off the recurrence path. ----
    # x lives in 2 (8,128) tiles; each x[:, t, :] is a cheap static slice.
    # These dots have no dependency on h, so the scheduler can issue them
    # ahead of / between the serial recurrence steps.
    x = x_ref[...]                        # (B, T, D)
    a = [
        jnp.dot(x[:, t, :], w_ih, preferred_element_type=jnp.float32) + b_rnn
        for t in range(T)
    ]                                     # T x (B, H)

    # ---- Serial recurrence: only the h -> h dependency remains. ----
    # Static unroll (T small & static).  NOTE: candidate micro-opts, pending a
    # bundle-dump / per-generation benchmark: keep W_hh resident in the MXU
    # (matmul_push_rhs once + acc_lhs/pop per step) or a VPU multiply-accumulate
    # formulation of this (2,20)@(20,20) product on v5e/v6e.
    h = jnp.zeros((B, H), jnp.float32)
    for t in range(T):
        h = jnp.tanh(a[t] + jnp.dot(h, w_hh, preferred_element_type=jnp.float32))

    # ---- Linear head (runs once). ----
    out_ref[...] = (
        jnp.dot(h, w_fc, preferred_element_type=jnp.float32) + b_fc
    )


def prepare_params(w_ih, w_hh, b_ih, b_hh, w_fc, b_fc):
    """One-time parameter prep (NOT in the per-call path).

    Packs all RNN parameters into one buffer and the fc parameters into
    another, pre-transposed so every in-kernel matmul is row-major `v @ W`.
    """
    H, D = w_ih.shape
    O = w_fc.shape[0]
    d_pad = ((D + 1 + 7) // 8) * 8        # sublane-align the W_hh^T block

    rnn_params = jnp.zeros((d_pad + H, H), jnp.float32)
    rnn_params = rnn_params.at[:D, :].set(jnp.transpose(w_ih))          # W_ih^T
    rnn_params = rnn_params.at[D, :].set(b_ih + b_hh)                   # fused bias
    rnn_params = rnn_params.at[d_pad:, :].set(jnp.transpose(w_hh))      # W_hh^T

    fc_params = jnp.concatenate(
        [jnp.transpose(w_fc), b_fc.reshape(1, O)], axis=0
    ).astype(jnp.float32)                                               # (H+1, O)
    return rnn_params, fc_params


@jax.jit
def simple_rnn_forward(x, rnn_params, fc_params):
    """x: (B, T, D) float32 (batch_first). Returns (B, OUTPUT_SIZE) float32."""
    B, T, D = x.shape
    O = fc_params.shape[1]
    vmem = pl.BlockSpec(memory_space=pltpu.MemorySpace.VMEM)
    return pl.pallas_call(
        rnn_kernel,
        out_shape=jax.ShapeDtypeStruct((B, O), jnp.float32),
        in_specs=[vmem, vmem, vmem],
        out_specs=vmem,
    )(x, rnn_params, fc_params)


def reference_forward(x, w_ih, w_hh, b_ih, b_hh, w_fc, b_fc):
    """Pure-JAX reference matching torch semantics."""
    B, T, _ = x.shape
    h = jnp.zeros((B, HIDDEN_SIZE), jnp.float32)
    for t in range(T):
        h = jnp.tanh(x[:, t, :] @ w_ih.T + b_ih + h @ w_hh.T + b_hh)
    return h @ w_fc.T + b_fc


if __name__ == "__main__":
    key = jax.random.PRNGKey(0)
    kx, k1, k2, k3, k4, k5, k6 = jax.random.split(key, 7)

    B, T = 2, 8
    x = jax.random.normal(kx, (B, T, INPUT_SIZE), jnp.float32)

    # Deterministic parameter init (PyTorch default: U(-1/sqrt(H), 1/sqrt(H))).
    bound = 1.0 / (HIDDEN_SIZE ** 0.5)
    w_ih = jax.random.uniform(k1, (HIDDEN_SIZE, INPUT_SIZE), jnp.float32, -bound, bound)
    w_hh = jax.random.uniform(k2, (HIDDEN_SIZE, HIDDEN_SIZE), jnp.float32, -bound, bound)
    b_ih = jax.random.uniform(k3, (HIDDEN_SIZE,), jnp.float32, -bound, bound)
    b_hh = jax.random.uniform(k4, (HIDDEN_SIZE,), jnp.float32, -bound, bound)
    w_fc = jax.random.uniform(k5, (OUTPUT_SIZE, HIDDEN_SIZE), jnp.float32, -bound, bound)
    b_fc = jax.random.uniform(k6, (OUTPUT_SIZE,), jnp.float32, -bound, bound)

    # One-time prep, outside the per-call (jitted) path.
    rnn_params, fc_params = prepare_params(w_ih, w_hh, b_ih, b_hh, w_fc, b_fc)

    out = simple_rnn_forward(x, rnn_params, fc_params)
    out = jax.block_until_ready(out)

    ref = reference_forward(x, w_ih, w_hh, b_ih, b_hh, w_fc, b_fc)
    assert out.shape == (B, OUTPUT_SIZE)
    assert jnp.allclose(out, ref, atol=1e-5, rtol=1e-5), (out, ref)

    print("KERNEL_OK")
</pallas_src>

<mosaic_0001>
module attributes {stable_mosaic.version = 11 : i64} {
  func.func @rnn_kernel(%arg0: memref<2x8x10xf32, #tpu.memory_space<vmem>>, %arg1: memref<36x20xf32, #tpu.memory_space<vmem>>, %arg2: memref<21x2xf32, #tpu.memory_space<vmem>>, %arg3: memref<2x2xf32, #tpu.memory_space<vmem>>) attributes {dimension_semantics = [], scalar_prefetch = 0 : i64, scratch_operands = 0 : i64, tpu.core_type = #tpu.core_type<tc>} {
    %c0 = arith.constant 0 : index
    %c0_0 = arith.constant 0 : index
    %0 = vector.load %arg1[%c0, %c0_0] : memref<36x20xf32, #tpu.memory_space<vmem>>, vector<10x20xf32>
    %c10 = arith.constant 10 : index
    %c0_1 = arith.constant 0 : index
    %1 = vector.load %arg1[%c10, %c0_1] : memref<36x20xf32, #tpu.memory_space<vmem>>, vector<1x20xf32>
    %c16 = arith.constant 16 : index
    %c0_2 = arith.constant 0 : index
    %2 = vector.load %arg1[%c16, %c0_2] : memref<36x20xf32, #tpu.memory_space<vmem>>, vector<20x20xf32>
    %c0_3 = arith.constant 0 : index
    %c0_4 = arith.constant 0 : index
    %3 = vector.load %arg2[%c0_3, %c0_4] : memref<21x2xf32, #tpu.memory_space<vmem>>, vector<20x2xf32>
    %c20 = arith.constant 20 : index
    %c0_5 = arith.constant 0 : index
    %4 = vector.load %arg2[%c20, %c0_5] : memref<21x2xf32, #tpu.memory_space<vmem>>, vector<1x2xf32>
    %c0_6 = arith.constant 0 : index
    %c0_7 = arith.constant 0 : index
    %c0_8 = arith.constant 0 : index
    %5 = vector.load %arg0[%c0_6, %c0_7, %c0_8] : memref<2x8x10xf32, #tpu.memory_space<vmem>>, vector<2x8x10xf32>
    %6 = vector.extract_strided_slice %5 {offsets = [0, 0, 0], sizes = [2, 1, 10], strides = [1, 1, 1]} : vector<2x8x10xf32> to vector<2x1x10xf32>
    %7 = vector.shape_cast %6 : vector<2x1x10xf32> to vector<2x10xf32>
    %cst = arith.constant dense<0.000000e+00> : vector<2x20xf32>
    %8 = tpu.matmul %7, %0, %cst {dimension_numbers = #tpu.dot_dimension_numbers<[1], [0], [0], [1], [0, 0, 1, 1], [], []>} : vector<2x10xf32>, vector<10x20xf32>, vector<2x20xf32> -> vector<2x20xf32>
    %9 = vector.broadcast %1 : vector<1x20xf32> to vector<2x20xf32>
    %10 = arith.addf %8, %9 : vector<2x20xf32>
    %11 = vector.extract_strided_slice %5 {offsets = [0, 1, 0], sizes = [2, 1, 10], strides = [1, 1, 1]} : vector<2x8x10xf32> to vector<2x1x10xf32>
    %12 = vector.shape_cast %11 : vector<2x1x10xf32> to vector<2x10xf32>
    %cst_9 = arith.constant dense<0.000000e+00> : vector<2x20xf32>
    %13 = tpu.matmul %12, %0, %cst_9 {dimension_numbers = #tpu.dot_dimension_numbers<[1], [0], [0], [1], [0, 0, 1, 1], [], []>} : vector<2x10xf32>, vector<10x20xf32>, vector<2x20xf32> -> vector<2x20xf32>
    %14 = vector.broadcast %1 : vector<1x20xf32> to vector<2x20xf32>
    %15 = arith.addf %13, %14 : vector<2x20xf32>
    %16 = vector.extract_strided_slice %5 {offsets = [0, 2, 0], sizes = [2, 1, 10], strides = [1, 1, 1]} : vector<2x8x10xf32> to vector<2x1x10xf32>
    %17 = vector.shape_cast %16 : vector<2x1x10xf32> to vector<2x10xf32>
    %cst_10 = arith.constant dense<0.000000e+00> : vector<2x20xf32>
    %18 = tpu.matmul %17, %0, %cst_10 {dimension_numbers = #tpu.dot_dimension_numbers<[1], [0], [0], [1], [0, 0, 1, 1], [], []>} : vector<2x10xf32>, vector<10x20xf32>, vector<2x20xf32> -> vector<2x20xf32>
    %19 = vector.broadcast %1 : vector<1x20xf32> to vector<2x20xf32>
    %20 = arith.addf %18, %19 : vector<2x20xf32>
    %21 = vector.extract_strided_slice %5 {offsets = [0, 3, 0], sizes = [2, 1, 10], strides = [1, 1, 1]} : vector<2x8x10xf32> to vector<2x1x10xf32>
    %22 = vector.shape_cast %21 : vector<2x1x10xf32> to vector<2x10xf32>
    %cst_11 = arith.constant dense<0.000000e+00> : vector<2x20xf32>
    %23 = tpu.matmul %22, %0, %cst_11 {dimension_numbers = #tpu.dot_dimension_numbers<[1], [0], [0], [1], [0, 0, 1, 1], [], []>} : vector<2x10xf32>, vector<10x20xf32>, vector<2x20xf32> -> vector<2x20xf32>
    %24 = vector.broadcast %1 : vector<1x20xf32> to vector<2x20xf32>
    %25 = arith.addf %23, %24 : vector<2x20xf32>
    %26 = vector.extract_strided_slice %5 {offsets = [0, 4, 0], sizes = [2, 1, 10], strides = [1, 1, 1]} : vector<2x8x10xf32> to vector<2x1x10xf32>
    %27 = vector.shape_cast %26 : vector<2x1x10xf32> to vector<2x10xf32>
    %cst_12 = arith.constant dense<0.000000e+00> : vector<2x20xf32>
    %28 = tpu.matmul %27, %0, %cst_12 {dimension_numbers = #tpu.dot_dimension_numbers<[1], [0], [0], [1], [0, 0, 1, 1], [], []>} : vector<2x10xf32>, vector<10x20xf32>, vector<2x20xf32> -> vector<2x20xf32>
    %29 = vector.broadcast %1 : vector<1x20xf32> to vector<2x20xf32>
    %30 = arith.addf %28, %29 : vector<2x20xf32>
    %31 = vector.extract_strided_slice %5 {offsets = [0, 5, 0], sizes = [2, 1, 10], strides = [1, 1, 1]} : vector<2x8x10xf32> to vector<2x1x10xf32>
    %32 = vector.shape_cast %31 : vector<2x1x10xf32> to vector<2x10xf32>
    %cst_13 = arith.constant dense<0.000000e+00> : vector<2x20xf32>
    %33 = tpu.matmul %32, %0, %cst_13 {dimension_numbers = #tpu.dot_dimension_numbers<[1], [0], [0], [1], [0, 0, 1, 1], [], []>} : vector<2x10xf32>, vector<10x20xf32>, vector<2x20xf32> -> vector<2x20xf32>
    %34 = vector.broadcast %1 : vector<1x20xf32> to vector<2x20xf32>
    %35 = arith.addf %33, %34 : vector<2x20xf32>
    %36 = vector.extract_strided_slice %5 {offsets = [0, 6, 0], sizes = [2, 1, 10], strides = [1, 1, 1]} : vector<2x8x10xf32> to vector<2x1x10xf32>
    %37 = vector.shape_cast %36 : vector<2x1x10xf32> to vector<2x10xf32>
    %cst_14 = arith.constant dense<0.000000e+00> : vector<2x20xf32>
    %38 = tpu.matmul %37, %0, %cst_14 {dimension_numbers = #tpu.dot_dimension_numbers<[1], [0], [0], [1], [0, 0, 1, 1], [], []>} : vector<2x10xf32>, vector<10x20xf32>, vector<2x20xf32> -> vector<2x20xf32>
    %39 = vector.broadcast %1 : vector<1x20xf32> to vector<2x20xf32>
    %40 = arith.addf %38, %39 : vector<2x20xf32>
    %41 = vector.extract_strided_slice %5 {offsets = [0, 7, 0], sizes = [2, 1, 10], strides = [1, 1, 1]} : vector<2x8x10xf32> to vector<2x1x10xf32>
    %42 = vector.shape_cast %41 : vector<2x1x10xf32> to vector<2x10xf32>
    %cst_15 = arith.constant dense<0.000000e+00> : vector<2x20xf32>
    %43 = tpu.matmul %42, %0, %cst_15 {dimension_numbers = #tpu.dot_dimension_numbers<[1], [0], [0], [1], [0, 0, 1, 1], [], []>} : vector<2x10xf32>, vector<10x20xf32>, vector<2x20xf32> -> vector<2x20xf32>
    %44 = vector.broadcast %1 : vector<1x20xf32> to vector<2x20xf32>
    %45 = arith.addf %43, %44 : vector<2x20xf32>
    %cst_16 = arith.constant 0.000000e+00 : f32
    %46 = vector.broadcast %cst_16 : f32 to vector<2x20xf32>
    %cst_17 = arith.constant dense<0.000000e+00> : vector<2x20xf32>
    %47 = tpu.matmul %46, %2, %cst_17 {dimension_numbers = #tpu.dot_dimension_numbers<[1], [0], [0], [1], [0, 0, 1, 1], [], []>} : vector<2x20xf32>, vector<20x20xf32>, vector<2x20xf32> -> vector<2x20xf32>
    %48 = arith.addf %10, %47 : vector<2x20xf32>
    %49 = math.tanh %48 : vector<2x20xf32>
    %cst_18 = arith.constant dense<0.000000e+00> : vector<2x20xf32>
    %50 = tpu.matmul %49, %2, %cst_18 {dimension_numbers = #tpu.dot_dimension_numbers<[1], [0], [0], [1], [0, 0, 1, 1], [], []>} : vector<2x20xf32>, vector<20x20xf32>, vector<2x20xf32> -> vector<2x20xf32>
    %51 = arith.addf %15, %50 : vector<2x20xf32>
    %52 = math.tanh %51 : vector<2x20xf32>
    %cst_19 = arith.constant dense<0.000000e+00> : vector<2x20xf32>
    %53 = tpu.matmul %52, %2, %cst_19 {dimension_numbers = #tpu.dot_dimension_numbers<[1], [0], [0], [1], [0, 0, 1, 1], [], []>} : vector<2x20xf32>, vector<20x20xf32>, vector<2x20xf32> -> vector<2x20xf32>
    %54 = arith.addf %20, %53 : vector<2x20xf32>
    %55 = math.tanh %54 : vector<2x20xf32>
    %cst_20 = arith.constant dense<0.000000e+00> : vector<2x20xf32>
    %56 = tpu.matmul %55, %2, %cst_20 {dimension_numbers = #tpu.dot_dimension_numbers<[1], [0], [0], [1], [0, 0, 1, 1], [], []>} : vector<2x20xf32>, vector<20x20xf32>, vector<2x20xf32> -> vector<2x20xf32>
    %57 = arith.addf %25, %56 : vector<2x20xf32>
    %58 = math.tanh %57 : vector<2x20xf32>
    %cst_21 = arith.constant dense<0.000000e+00> : vector<2x20xf32>
    %59 = tpu.matmul %58, %2, %cst_21 {dimension_numbers = #tpu.dot_dimension_numbers<[1], [0], [0], [1], [0, 0, 1, 1], [], []>} : vector<2x20xf32>, vector<20x20xf32>, vector<2x20xf32> -> vector<2x20xf32>
    %60 = arith.addf %30, %59 : vector<2x20xf32>
    %61 = math.tanh %60 : vector<2x20xf32>
    %cst_22 = arith.constant dense<0.000000e+00> : vector<2x20xf32>
    %62 = tpu.matmul %61, %2, %cst_22 {dimension_numbers = #tpu.dot_dimension_numbers<[1], [0], [0], [1], [0, 0, 1, 1], [], []>} : vector<2x20xf32>, vector<20x20xf32>, vector<2x20xf32> -> vector<2x20xf32>
    %63 = arith.addf %35, %62 : vector<2x20xf32>
    %64 = math.tanh %63 : vector<2x20xf32>
    %cst_23 = arith.constant dense<0.000000e+00> : vector<2x20xf32>
    %65 = tpu.matmul %64, %2, %cst_23 {dimension_numbers = #tpu.dot_dimension_numbers<[1], [0], [0], [1], [0, 0, 1, 1], [], []>} : vector<2x20xf32>, vector<20x20xf32>, vector<2x20xf32> -> vector<2x20xf32>
    %66 = arith.addf %40, %65 : vector<2x20xf32>
    %67 = math.tanh %66 : vector<2x20xf32>
    %cst_24 = arith.constant dense<0.000000e+00> : vector<2x20xf32>
    %68 = tpu.matmul %67, %2, %cst_24 {dimension_numbers = #tpu.dot_dimension_numbers<[1], [0], [0], [1], [0, 0, 1, 1], [], []>} : vector<2x20xf32>, vector<20x20xf32>, vector<2x20xf32> -> vector<2x20xf32>
    %69 = arith.addf %45, %68 : vector<2x20xf32>
    %70 = math.tanh %69 : vector<2x20xf32>
    %cst_25 = arith.constant dense<0.000000e+00> : vector<2x2xf32>
    %71 = tpu.matmul %70, %3, %cst_25 {dimension_numbers = #tpu.dot_dimension_numbers<[1], [0], [0], [1], [0, 0, 1, 1], [], []>} : vector<2x20xf32>, vector<20x2xf32>, vector<2x2xf32> -> vector<2x2xf32>
    %72 = vector.broadcast %4 : vector<1x2xf32> to vector<2x2xf32>
    %73 = arith.addf %71, %72 : vector<2x2xf32>
    %c0_26 = arith.constant 0 : index
    %c0_27 = arith.constant 0 : index
    %74 = vector.load %arg3[%c0_26, %c0_27] : memref<2x2xf32, #tpu.memory_space<vmem>>, vector<2x2xf32>
    tpu.vector_store %arg3[%c0_26, %c0_27], %73 {strides = array<i32>} : memref<2x2xf32, #tpu.memory_space<vmem>>, vector<2x2xf32>,
    return
  }
}

</mosaic_0001>

<bundles_post_ra>
// kernel: simple_rnn_forward.1
= control target key start
LH: loop header
LB: loop body
LE: loop exit
PB: predicated region body
PF: predicated region fallthrough
CT: control target
= control target key end

     0   :  { %vm39_vm0 = vcmask 1041408   ;;  %v1697_v2 = vmov 0.0|0.0   ;;  %vm1698_vm1 = vmmov 1   ;;  %vm34_vm3 = vcmask 1041409   ;;  %s1944_s0 = inlined_call_operand.vmem [shape: f32[2,8,10], index: 0, kind: input, shape index: {}]   ;;  %s1945_s1 = inlined_call_operand.vmem [shape: f32[36,20], index: 1, kind: input, shape index: {}]   ;;  %s1946_s2 = inlined_call_operand.vmem [shape: f32[21,2], index: 2, kind: input, shape index: {}]   ;;  %s1947_s3 = inlined_call_operand.hbm [shape: f32[2,2], index: 3, kind: output, shape index: {}]  }
   0x1   :  { %v15_v0 = vld [vmem:[%s1945_s1] sm:$0xff]  ;;  %v16_v1 = vld [vmem:[%s1945_s1 + $0x8] sm:$0x3]  ;;  %1578 = vmatprep.subr.bf16.mxu0 %v1697_v2  ;;  %vm1731_vm2 = vmpackc.low %vm39_vm0, %vm1698_vm1  ;;  %1570 = vmatprep.subr.bf16.mxu1 %v1697_v2  ;;  %vm1699_vm4 = vmmov 0   ;;  %v1700_v7 = vmov 0.0   ;;  %vm36_vm5 = vcmask 80896  }
   0x2   :  { %v1729_v3 = vpack.c.bf16 %v16_v1, %v15_v0  ;;  %v1738_v5 = vld [vmem:[%s1944_s0] sm:$0xff]  ;;  %v1743_v6 = vld [vmem:[%s1944_s0 + $0x8] sm:$0xff]  ;;  %1451 = vmatprep.mubr.msk.f32.mxu0 %vm1699_vm4, %v1700_v7  ;;  %1437 = vmatprep.mubr.msk.f32.mxu1 %vm1699_vm4, %v1700_v7 }
   0x3   :  { %v187_v8 = vrot.slane %v1738_v5, 2  ;;  %v188_v9 = vrot.slane %v1743_v6, 1  ;;  %v337_v10 = vrot.slane %v1738_v5, 4  ;;  %v338_v11 = vrot.slane %v1743_v6, 3 }
   0x4   :  { %1581 = vmatpush3.bf16.msk.msra.mxu0 %vm1731_vm2, %v1729_v3  ;;  %1573 = vmatpush3.bf16.msk.msra.mxu1 %vm1731_vm2, %v1729_v3  ;;  %v33_v13 = vrot.slane %v1743_v6, 7  ;;  %v113_v14 = vrot.slane %v1738_v5, 1 }
   0x5   :  { %1586 = vmatprep.subr.bf16.mxu0 %v1697_v2  ;;  %v189_v12 = vsel %vm34_vm3, %v188_v9, %v187_v8  ;;  %1574 = vmatprep.subr.bf16.mxu1 %v1697_v2 }
   0x6   :  { %8 = vsyncpa [#allocation3], 0  ;;  %v35_v15 = vsel %vm34_vm3, %v33_v13, %v1738_v5  ;;  %v339_v16 = vsel %vm34_vm3, %v338_v11, %v337_v10  ;;  %v487_v17 = vrot.slane %v1738_v5, 6  ;;  %v488_v18 = vrot.slane %v1743_v6, 5  ;;  %v18_v19 = vld [vmem:[%s1945_s1 + $0x10] sm:$0xff]  ;;  %v19_v20 = vld [vmem:[%s1945_s1 + $0x18] sm:$0xff] }
   0x7   :  { %1452 = vmatmul.mubr.msk.f32.vlgmr.msra.gmra.mrb[0].mxu0 %vm36_vm5, %v189_v12  ;;  %1438 = vmatmul.mubr.msk.f32.vlgmr.msra.gmra.mrb[0].mxu1 %vm36_vm5, %v35_v15  ;;  %v114_v21 = vsel %vm34_vm3, %v1743_v6, %v113_v14  ;;  %v1799_v23 = vpack.c.bf16 %v19_v20, %v18_v19  ;;  %v1817_v24 = vld [vmem:[%s1945_s1 + $0x20] sm:$0xf]  ;;  %vm641_vm6 = vcmask 1043456   ;;  %v262_v25 = vrot.slane %v1738_v5, 3  ;;  %v1864_v36 = vld [vmem:[%s1945_s1 + $0xa] ss:$0 sm:$0xff] }
   0x8   :  { %1589 = vmatpush3.bf16.msk.msra.mxu0 %vm1731_vm2, %v1729_v3  ;;  %1465 = vmatprep.mubr.msk.f32.mxu0 %vm1699_vm4, %v1700_v7  ;;  %v489_v22 = vsel %vm34_vm3, %v488_v18, %v487_v17  ;;  %v263_v26 = vrot.slane %v1743_v6, 2  ;;  %v412_v28 = vrot.slane %v1738_v5, 5  ;;  %v413_v29 = vrot.slane %v1743_v6, 4  ;;  %v1370_v11 = vld [vmem:[%s1946_s2 + $0x14] ss:$0 sm:$0xff]  ;;  %s1701_s7 = smov [#allocation2]  }
   0x9   :  { %1594 = vmatprep.subr.bf16.mxu0 %v1697_v2  ;;  %1577 = vmatpush3.bf16.msk.msra.mxu1 %vm1731_vm2, %v1729_v3  ;;  %v562_v30 = vrot.slane %v1738_v5, 7  ;;  %v563_v31 = vrot.slane %v1743_v6, 6  ;;  %vm637_vm7 = vcmask 162816   ;;  %v23_v5 = vld [vmem:[%s1946_s2 + $0x10] sm:$0xf]  ;;  %s1330_s8 = sshll.u32 %s1701_s7, 4  ;;  %s1331_s8 = int_to_ptr.vmem [resolvable:$true] %s1330_s8 }
   0xa   :  { %1444 = vmatprep.mubr.msk.f32.mxu1 %vm1699_vm4, %v1700_v7  ;;  %1582 = vmatprep.subr.bf16.mxu1 %v1697_v2  ;;  %v264_v27 = vsel %vm34_vm3, %v263_v26, %v262_v25  ;;  %v414_v32 = vsel %vm34_vm3, %v413_v29, %v412_v28  ;;  %vm1322_vm8 = vcmask 9216   ;;  %s1673_s9 = scalar_lea.vmem %s1331_s8, 32  ;;  %p1678_p1 = scmp.lt.s32.totalorder %s1331_s8, %s1331_s8 }
   0xb   :  { %1466 = vmatmul.mubr.msk.f32.vlgmr.msra.gmra.mrb[2].mxu0 %vm36_vm5, %v339_v16  ;;  %v564_v33 = vsel %vm34_vm3, %v563_v31, %v562_v30  ;;  %p1674_p0 = scmp.ne.s32.totalorder %s1331_s8, %s1673_s9  ;;  %p1679_p2 = scmp.lt.s32.totalorder %s1673_s9, %s1673_s9 }
   0xc   :  { %1597 = vmatpush3.bf16.msk.msra.mxu0 %vm1731_vm2, %v1729_v3  ;;  %1479 = vmatprep.mubr.msk.f32.mxu0 %vm1699_vm4, %v1700_v7 }
   0xd   :  { %1602 = vmatprep.subr.bf16.mxu0 %v1697_v2  ;;  %1445 = vmatmul.mubr.msk.f32.vlgmr.msra.gmra.mrb[2].mxu1 %vm36_vm5, %v114_v21  ;;  %p1680_p3 = por %p1679_p2, %p1678_p1 }
   0xe   :  { %1585 = vmatpush3.bf16.msk.msra.mxu1 %vm1731_vm2, %v1729_v3  ;;  %1458 = vmatprep.mubr.msk.f32.mxu1 %vm1699_vm4, %v1700_v7 }
   0xf   :  { %1480 = vmatmul.mubr.msk.f32.vlgmr.msra.gmra.mrb[4].mxu0 %vm36_vm5, %v489_v22  ;;  %1590 = vmatprep.subr.bf16.mxu1 %v1697_v2  ;;  %p1681_p4 = pnand %p1680_p3, %p1674_p0 }
  0x10   :  { %1604 = vmatpush3.bf16.msra.mxu0 %v1799_v23  ;;  %1495 = vmatprep.mubr.msk.f32.mxu0 %vm1699_vm4, %v1700_v7 }
  0x11   :  { %1493 = vmatprep.subr.mxu0 %v1700_v7  ;;  %1459 = vmatmul.mubr.msk.f32.vlgmr.msra.gmra.mrb[4].mxu1 %vm36_vm5, %v264_v27 }
  0x12   :  { %1593 = vmatpush3.bf16.msk.msra.mxu1 %vm1731_vm2, %v1729_v3  ;;  %1472 = vmatprep.mubr.msk.f32.mxu1 %vm1699_vm4, %v1700_v7 }
  0x13   :  { %1598 = vmatprep.subr.bf16.mxu1 %v1697_v2 }
  0x14   :  { %1494 = vmatpush3.msk.msra.mxu0 %vm641_vm6, %v1817_v24 }
  0x15   :  { %1496 = vmatmul.mubr.f32.vlgmr.msra.gmra.mrb[6].mxu0 %v1700_v7  ;;  %1608 = vmatprep.subr.bf16.mxu0 %v1697_v2 }
  0x16   :  { %1610 = vmatpush3.bf16.msra.mxu0 %v1799_v23  ;;  %1513 = vmatprep.mubr.msk.f32.mxu0 %vm1699_vm4, %v1700_v7 }
  0x17   :  { %1511 = vmatprep.subr.mxu0 %v1700_v7  ;;  %1473 = vmatmul.mubr.msk.f32.vlgmr.msra.gmra.mrb[6].mxu1 %vm36_vm5, %v414_v32 }
  0x18   :  { %1601 = vmatpush3.bf16.msk.msra.mxu1 %vm1731_vm2, %v1729_v3  ;;  %1486 = vmatprep.mubr.msk.f32.mxu1 %vm1699_vm4, %v1700_v7  ;;  %v22_v3 = vld [vmem:[%s1946_s2 + $0x8] sm:$0xff] }
  0x19   :  { %1605 = vmatprep.subr.bf16.mxu1 %v1697_v2 }
  0x1a   :  { %1512 = vmatpush3.msk.msra.mxu0 %vm641_vm6, %v1817_v24 }
  0x1b   :  { %1614 = vmatprep.subr.bf16.mxu0 %v1697_v2  ;;  %1487 = vmatmul.mubr.msk.f32.vlgmr.msra.gmra.mrb[8].mxu1 %vm36_vm5, %v564_v33 }
  0x1c   :  { %1607 = vmatpush3.bf16.msra.mxu1 %v1799_v23  ;;  %1504 = vmatprep.mubr.msk.f32.mxu1 %vm1699_vm4, %v1700_v7 }
  0x1d   :  { %1502 = vmatprep.subr.mxu1 %v1700_v7 }
  0x20   :  { %1503 = vmatpush3.msk.msra.mxu1 %vm641_vm6, %v1817_v24 }
  0x21   :  { %1611 = vmatprep.subr.bf16.mxu1 %v1697_v2 }
  0xda   :  { %v109_v34 = vpop.f32.mrb[0].mxu1 }
  0xdb   :  { %v1439_v35 = vpop.f32.mrb[1].mxu1  ;;  %v110_v37 = vadd.f32 %v1864_v36, %v109_v34 }
  0xe8   :  { %v711_v38 = vpop.f32.mrb[6].mxu0 }
  0xe9   :  { %v715_v39 = vadd.f32 %v711_v38, %v110_v37  ;;  %v1497_v40 = vpop.f32.mrb[7].mxu0 }
  0xeb   :  { %1657 = vtanh.f32 %v715_v39 }
  0xf5   :  { %v1658_v41 = vpop.eup %1657 }
  0xf6   :  { %1505 = vmatmul.mubr.msk.f32.vlgmr.msra.gmra.mrb[2].mxu1 %vm637_vm7, %v1658_v41 }
  0xf7   :  { %1613 = vmatpush3.bf16.msra.mxu1 %v1799_v23  ;;  %1522 = vmatprep.mubr.msk.f32.mxu1 %vm1699_vm4, %v1700_v7 }
  0xf8   :  { %1520 = vmatprep.subr.mxu1 %v1700_v7 }
  0xfb   :  { %1521 = vmatpush3.msk.msra.mxu1 %vm641_vm6, %v1817_v24 }
  0xfc   :  { %1617 = vmatprep.subr.bf16.mxu1 %v1697_v2 }
 0x1c9   :  { %v786_v42 = vpop.f32.mrb[2].mxu1 }
 0x1ca   :  { %v1631_v43 = vadd.f32 %v1864_v36, %v786_v42  ;;  %v1506_v44 = vpop.f32.mrb[3].mxu1 }
 0x1cc   :  { %1659 = vtanh.f32 %v1631_v43 }
 0x1d6   :  { %v1660_v45 = vpop.eup %1659 }
 0x1d7   :  { %1514 = vmatmul.mubr.msk.f32.vlgmr.msra.gmra.mrb[0].mxu0 %vm637_vm7, %v1660_v45 }
 0x1d8   :  { %1616 = vmatpush3.bf16.msra.mxu0 %v1799_v23  ;;  %1531 = vmatprep.mubr.msk.f32.mxu0 %vm1699_vm4, %v1700_v7 }
 0x1d9   :  { %1529 = vmatprep.subr.mxu0 %v1700_v7 }
 0x1dc   :  { %1530 = vmatpush3.msk.msra.mxu0 %vm641_vm6, %v1817_v24 }
 0x1dd   :  { %1620 = vmatprep.subr.bf16.mxu0 %v1697_v2 }
 0x2aa   :  { %v861_v46 = vpop.f32.mrb[0].mxu0 }
 0x2ab   :  { %v1632_v47 = vadd.f32 %v1864_v36, %v861_v46  ;;  %v1515_v48 = vpop.f32.mrb[1].mxu0 }
 0x2ad   :  { %1661 = vtanh.f32 %v1632_v47 }
 0x2b7   :  { %v1662_v49 = vpop.eup %1661 }
 0x2b8   :  { %1523 = vmatmul.mubr.msk.f32.vlgmr.msra.gmra.mrb[4].mxu1 %vm637_vm7, %v1662_v49 }
 0x2b9   :  { %1619 = vmatpush3.bf16.msra.mxu1 %v1799_v23  ;;  %1540 = vmatprep.mubr.msk.f32.mxu1 %vm1699_vm4, %v1700_v7 }
 0x2ba   :  { %1538 = vmatprep.subr.mxu1 %v1700_v7 }
 0x2bd   :  { %1539 = vmatpush3.msk.msra.mxu1 %vm641_vm6, %v1817_v24 }
 0x2be   :  { %1623 = vmatprep.subr.bf16.mxu1 %v1697_v2 }
 0x38b   :  { %v936_v50 = vpop.f32.mrb[4].mxu1 }
 0x38c   :  { %v1633_v51 = vadd.f32 %v1864_v36, %v936_v50  ;;  %v1524_v52 = vpop.f32.mrb[5].mxu1 }
 0x38e   :  { %1663 = vtanh.f32 %v1633_v51 }
 0x398   :  { %v1664_v53 = vpop.eup %1663 }
 0x399   :  { %1532 = vmatmul.mubr.msk.f32.vlgmr.msra.gmra.mrb[2].mxu0 %vm637_vm7, %v1664_v53 }
 0x39a   :  { %1622 = vmatpush3.bf16.msra.mxu0 %v1799_v23  ;;  %1549 = vmatprep.mubr.msk.f32.mxu0 %vm1699_vm4, %v1700_v7 }
 0x39b   :  { %1547 = vmatprep.subr.mxu0 %v1700_v7 }
 0x39e   :  { %1548 = vmatpush3.msk.msra.mxu0 %vm641_vm6, %v1817_v24 }
 0x39f   :  { %1626 = vmatprep.subr.bf16.mxu0 %v1697_v2  ;;  %v21_v2 = vld [vmem:[%s1946_s2] sm:$0xff] }
 0x3a0   :  { %v1627_v4 = vpack.c.bf16 %v22_v3, %v21_v2 }
 0x46c   :  { %v1011_v54 = vpop.f32.mrb[2].mxu0 }
 0x46d   :  { %v1634_v55 = vadd.f32 %v1864_v36, %v1011_v54  ;;  %v1533_v56 = vpop.f32.mrb[3].mxu0 }
 0x46f   :  { %1665 = vtanh.f32 %v1634_v55 }
 0x479   :  { %v1666_v57 = vpop.eup %1665 }
 0x47a   :  { %1541 = vmatmul.mubr.msk.f32.vlgmr.msra.gmra.mrb[6].mxu1 %vm637_vm7, %v1666_v57 }
 0x47b   :  { %1625 = vmatpush3.bf16.msra.mxu1 %v1799_v23  ;;  %1558 = vmatprep.mubr.msk.f32.mxu1 %vm1699_vm4, %v1700_v7 }
 0x47c   :  { %1556 = vmatprep.subr.mxu1 %v1700_v7 }
 0x47f   :  { %1557 = vmatpush3.msk.msra.mxu1 %vm641_vm6, %v1817_v24 }
 0x54d   :  { %v1086_v58 = vpop.f32.mrb[6].mxu1 }
 0x54e   :  { %v1635_v59 = vadd.f32 %v1864_v36, %v1086_v58  ;;  %v1542_v60 = vpop.f32.mrb[7].mxu1 }
 0x550   :  { %1667 = vtanh.f32 %v1635_v59 }
 0x55a   :  { %v1668_v61 = vpop.eup %1667 }
 0x55b   :  { %1550 = vmatmul.mubr.msk.f32.vlgmr.msra.gmra.mrb[4].mxu0 %vm637_vm7, %v1668_v61 }
 0x55c   :  { %1567 = vmatprep.mubr.msk.f32.mxu0 %vm1699_vm4, %v1700_v7  ;;  %1628 = vmatpush3.bf16.msra.mxu0 %v1627_v4 }
 0x55d   :  { %1565 = vmatprep.subr.mxu0 %v1700_v7 }
 0x560   :  { %1566 = vmatpush3.msk.msra.mxu0 %vm641_vm6, %v23_v5 }
 0x62e   :  { %v1161_v62 = vpop.f32.mrb[4].mxu0 }
 0x62f   :  { %v1636_v63 = vadd.f32 %v1864_v36, %v1161_v62  ;;  %v1551_v0 = vpop.f32.mrb[5].mxu0 }
 0x631   :  { %1669 = vtanh.f32 %v1636_v63 }
 0x63b   :  { %v1670_v1 = vpop.eup %1669 }
 0x63c   :  { %1559 = vmatmul.mubr.msk.f32.vlgmr.msra.gmra.mrb[8].mxu1 %vm637_vm7, %v1670_v1 }
 0x70f   :  { %v1236_v6 = vpop.f32.mrb[8].mxu1 }
 0x710   :  { %v1637_v8 = vadd.f32 %v1864_v36, %v1236_v6  ;;  %v1560_v9 = vpop.f32.mrb[9].mxu1 }
 0x712   :  { %1671 = vtanh.f32 %v1637_v8 }
 0x71c   :  { %v1672_v10 = vpop.eup %1671 }
 0x71d   :  { %1568 = vmatmul.mubr.msk.f32.vlgmr.msra.gmra.mrb[8].mxu0 %vm637_vm7, %v1672_v10 }
 0x7f0   :  { %v1318_v7 = vpop.f32.mrb[8].mxu0 }
 0x7f1   :  { %v1319_v12 = vadd.f32 %v1370_v11, %v1318_v7  ;;  %v1569_v13 = vpop.f32.mrb[9].mxu0 }
 0x7f3   :  { %1323 = vst.msk [vmem:[#allocation2] sm:$0x3] %vm1322_vm8, %v1319_v12 }
 0x7f4   :  { %1684 = shalt.err (!%p1681_p4)
}
 0x7f5   :  { %s1685_s12 = scalar_lea.hbm %s1947_s3, 32 }
 0x7f6   :  { %p1686_p5 = scmp.ne.s32.totalorder %s1947_s3, %s1685_s12  ;;  %p1689_p6 = scmp.lt.u32.totalorder %s1685_s12, %s1947_s3 }
 0x7f8   :  { %p1691_p7 = pnand %p1689_p6, %p1686_p5 }
 0x7fa   :  { %1694 = shalt.err (!%p1691_p7)
}
 0x7fb   :  { %1333 = dma.vmem_to_hbm [thread:$0]  %s1331_s8, 32, %s1947_s3, [#allocation3]  }
 0x7fc   :  { %1695 = dma.done.wait [#allocation3], 32  }
 0x7fd   :  { %1696 = vsyncadd [#allocation3], 4294967264 }
 0x7fe   :  { %1337 = vsyncpa [#allocation3], 1 }

</bundles_post_ra>
